<compile_context>
chip_gen: v6e
topology: v6e:2x2x1
jax: 0.10.0
libtpu: 0.0.40
codegen_flags: <defaults>
</compile_context>

<pallas_src>
import functools

import numpy as np

import jax
import jax.numpy as jnp
from jax.experimental import pallas as pl
from jax.experimental.pallas import tpu as pltpu

NEG_SLOPE = 0.01  # nn.LeakyReLU default negative_slope


# --------------------------------------------------------------------------- host-side ops
def _interp_matrix(n_in, n_out):
    """Bilinear interpolation matrix A (n_out, n_in), align_corners=True:
    (A @ x) upsamples axis 0 exactly like nn.UpsamplingBilinear2d."""
    a = np.zeros((n_out, n_in), np.float32)
    if n_in == 1 or n_out == 1:
        src = np.zeros((n_out,), np.float64)
    else:
        src = np.arange(n_out, dtype=np.float64) * (n_in - 1) / (n_out - 1)
    lo = np.clip(np.floor(src).astype(np.int64), 0, n_in - 1)
    hi = np.minimum(lo + 1, n_in - 1)
    frac = (src - lo).astype(np.float32)
    rows = np.arange(n_out)
    np.add.at(a, (rows, lo), 1.0 - frac)
    np.add.at(a, (rows, hi), frac)
    return a


def _tap_shifted(a):
    """Stack [d=0,1,2] where row q of slice d is a[q + d - 1], zero rows at the pad edges:
    the conv tap offset AND the zero padding folded into the operator."""
    z = np.zeros((1, a.shape[1]), np.float32)
    return np.stack([
        np.concatenate([z, a[:-1]], axis=0),   # tap reads row q-1
        a,                                     # tap reads row q
        np.concatenate([a[1:], z], axis=0),    # tap reads row q+1
    ], axis=0)


def _pick_row_block(h2, max_rows=256):
    """Largest multiple-of-8 divisor of h2 (<= max_rows) that still yields >= 2 row blocks;
    falls back to a single full-height block."""
    best = h2
    for t in range(8, min(h2, max_rows + 1), 8):
        if h2 % t == 0:
            best = t
    return best


def build_upsample_operators(w_oihw, bias, height, width):
    """Fold the 3x3 conv into the bilinear operators (pure numpy, host side).
    Call once per weight update -- the per-forward path rebuilds nothing."""
    w_np = np.asarray(w_oihw, np.float32)             # (Cout, Cin, 3, 3)
    b_np = np.asarray(bias, np.float32)               # (Cout,)
    cout, cin = w_np.shape[0], w_np.shape[1]
    h, w = int(height), int(width)
    h2, w2 = 2 * h, 2 * w

    # Lane-density guard: pad Cout so lanes = Cout*W2 is a multiple of 128
    # (keeps the single output store unmasked / lane-dense at any HookNet config).
    cout_pad = cout
    while (cout_pad * w2) % 128 != 0:
        cout_pad += 1
    w_pad = np.zeros((cout_pad, cin, 3, 3), np.float32)
    w_pad[:cout] = w_np
    b_pad = np.zeros((cout_pad,), np.float32)
    b_pad[:cout] = b_np
    lanes = cout_pad * w2
    cinw = cin * w

    # dy-shifted H-interpolation rows (stage-1 LHS), stacked (3, H2, H).
    ah_stack = _tap_shifted(_interp_matrix(h, h2))

    # Stage-2 RHS with the conv folded in:
    #   B[dy, ci*W + w, co*W2 + q] = sum_dx conv_w[co, ci, dy, dx] * Aw_dx[q, w]
    aw_shift = _tap_shifted(_interp_matrix(w, w2))                    # (3, W2, W)
    b_full = np.einsum('ocyx,xqw->ycwoq', w_pad, aw_shift)            # (3,Cin,W,Cout',W2)
    b_stack = np.ascontiguousarray(b_full.reshape(3, cinw, lanes), np.float32)

    brow = np.repeat(b_pad, w2)[None, :].astype(np.float32)           # (1, lanes)

    tp = _pick_row_block(h2)                                          # output-row block

    # Explicit VMEM budget (review: set vmem_limit_bytes; matters on v7x's 64 MiB VMEM).
    blk_bytes = 4 * (2 * h * cinw             # x panel        (double-buffered)
                     + 2 * 3 * tp * h         # Ah row block   (double-buffered)
                     + 2 * 3 * cinw * lanes   # folded B       (worst case: 2 buffers)
                     + 2 * lanes              # bias row
                     + 2 * tp * lanes)        # output block
    vmem_limit = int(min(max(2 * blk_bytes, 32 << 20), 48 << 20))

    return dict(
        ah_stack=jnp.asarray(ah_stack), b_stack=jnp.asarray(b_stack),
        brow=jnp.asarray(brow),
        cin=cin, cout=cout, cout_pad=cout_pad, h=h, w=w, h2=h2, w2=w2,
        lanes=lanes, tp=tp, vmem_limit_bytes=vmem_limit)


# --------------------------------------------------------------------------- kernel
def _fused_upsample_conv_kernel(x_ref, ah_ref, b_ref, brow_ref, o_ref, *, tp, lanes):
    # x_ref   : (1, H, Cin*W)       input rows for this batch element
    # ah_ref  : (3, TP, H)          dy-shifted bilinear H-interp rows for this row block
    # b_ref   : (3, Cin*W, lanes)   conv-folded W-interp operators (constant)
    # brow_ref: (1, lanes)          lane-replicated bias (constant)
    # o_ref   : (1, TP, lanes)      lane-dense output block
    x = x_ref[0]                                                    # (H, Cin*W)
    acc = jnp.broadcast_to(brow_ref[...], (tp, lanes))              # bias-initialised acc
    for dy in range(3):                                             # all-MXU: 6 matmuls/step
        u1 = jnp.dot(ah_ref[dy], x, preferred_element_type=jnp.float32)
        acc = acc + jnp.dot(u1, b_ref[dy], preferred_element_type=jnp.float32)
    o_ref[0] = jnp.where(acc >= 0.0, acc, NEG_SLOPE * acc)          # LeakyReLU


# --------------------------------------------------------------------------- wrappers
def upsample_apply(x, ops):
    """Per-forward fast path: layout plumbing + one pallas_call."""
    n, cin, h, w = x.shape
    assert (cin, h, w) == (ops["cin"], ops["h"], ops["w"]), "operators built for another shape"
    h2, w2, lanes, tp = ops["h2"], ops["w2"], ops["lanes"], ops["tp"]
    cinw = cin * w

    # NCHW -> (N, H, Cin*W): the stage-1 H-contraction then covers all channels at once.
    # TODO(synk): for very large H also block the x rows (1-row halo) so the full input
    # row panel need not stay resident per grid step.
    x2 = jnp.transpose(x.astype(jnp.float32), (0, 2, 1, 3)).reshape(n, h, cinw)

    kernel = functools.partial(_fused_upsample_conv_kernel, tp=tp, lanes=lanes)
    n_row_blocks = h2 // tp

    def run(single_buffer_consts):
        # Constant operands never change block index; single-buffer them to halve their
        # VMEM footprint.  The fallback covers jax versions without Buffered lowering.
        const_kw = {"pipeline_mode": pl.Buffered(1)} if single_buffer_consts else {}
        return pl.pallas_call(
            kernel,
            out_shape=jax.ShapeDtypeStruct((n, h2, lanes), jnp.float32),
            grid=(n, n_row_blocks),
            in_specs=[
                pl.BlockSpec((1, h, cinw), lambda i, r: (i, 0, 0)),           # x panel
                pl.BlockSpec((3, tp, h), lambda i, r: (0, r, 0)),             # Ah rows
                pl.BlockSpec((3, cinw, lanes), lambda i, r: (0, 0, 0), **const_kw),
                pl.BlockSpec((1, lanes), lambda i, r: (0, 0), **const_kw),
            ],
            out_specs=pl.BlockSpec((1, tp, lanes), lambda i, r: (i, r, 0)),
            compiler_params=pltpu.CompilerParams(
                dimension_semantics=("parallel", "parallel"),
                vmem_limit_bytes=ops["vmem_limit_bytes"]),
        )(x2, ops["ah_stack"], ops["b_stack"], ops["brow"])

    try:
        out_flat = run(True)
    except Exception:
        # pl.Buffered(pipeline_mode=...) not supported on this jax -> default buffering.
        out_flat = run(False)

    # (N, H2, Cout_pad*W2) -> (N, Cout, H2, W2): wrapper-side layout plumbing only.
    out = jnp.transpose(out_flat.reshape(n, h2, ops["cout_pad"], w2), (0, 2, 1, 3))
    return out[:, :ops["cout"]]


def upsample_forward(x, w_oihw, bias):
    """UpSample.forward convenience wrapper (builds operators then applies)."""
    _, _, h, w = x.shape
    return upsample_apply(x, build_upsample_operators(w_oihw, bias, h, w))


def reference_forward(x, w_oihw, bias):
    """Pure-JAX reference for verification."""
    n, cin, h, w = x.shape
    ah = jnp.asarray(_interp_matrix(h, 2 * h))
    aw = jnp.asarray(_interp_matrix(w, 2 * w))
    up = jnp.einsum('ph,nchw->ncpw', ah, x)
    up = jnp.einsum('qw,ncpw->ncpq', aw, up)
    out = jax.lax.conv_general_dilated(
        up, w_oihw, window_strides=(1, 1), padding=((1, 1), (1, 1)),
        dimension_numbers=('NCHW', 'OIHW', 'NCHW'))
    out = out + bias[None, :, None, None]
    return jnp.where(out >= 0, out, NEG_SLOPE * out)


if __name__ == "__main__":
    key = jax.random.PRNGKey(0)
    kx, kw, kb = jax.random.split(key, 3)
    N, CIN, H, W = 2, 4, 16, 16
    COUT = 8

    x = jax.random.normal(kx, (N, CIN, H, W), jnp.float32)
    # deterministic Conv2d-style init (kaiming-uniform-ish bounds)
    fan_in = CIN * 3 * 3
    bound = 1.0 / (fan_in ** 0.5)
    w_oihw = jax.random.uniform(kw, (COUT, CIN, 3, 3), jnp.float32, -bound, bound)
    bias = jax.random.uniform(kb, (COUT,), jnp.float32, -bound, bound)

    # Operator construction hoisted out of the per-forward path (once per weight update).
    ops = build_upsample_operators(w_oihw, bias, H, W)
    out = upsample_apply(x, ops)
    out = jax.block_until_ready(out)
    assert out.shape == (N, COUT, 2 * H, 2 * W)

    ref = reference_forward(x, w_oihw, bias)
    max_err = float(jnp.max(jnp.abs(out - ref)))
    assert max_err < 1e-3, f"mismatch vs reference: {max_err}"
    print("KERNEL_OK")
</pallas_src>

<mosaic_0001>
module attributes {stable_mosaic.version = 11 : i64} {
  func.func @_fused_upsample_conv_kernel(%arg0: i32, %arg1: i32, %arg2: memref<1x16x64xf32, #tpu.memory_space<vmem>>, %arg3: memref<3x16x16xf32, #tpu.memory_space<vmem>>, %arg4: memref<3x64x256xf32, #tpu.memory_space<vmem>>, %arg5: memref<1x256xf32, #tpu.memory_space<vmem>>, %arg6: memref<1x16x256xf32, #tpu.memory_space<vmem>>) attributes {dimension_semantics = [#tpu.dimension_semantics<parallel>, #tpu.dimension_semantics<parallel>], iteration_bounds = array<i64: 2, 2>, scalar_prefetch = 0 : i64, scratch_operands = 0 : i64, tpu.core_type = #tpu.core_type<tc>, window_params = [{transform_indices = @transform_0, window_bounds = array<i64: 1, 16, 64>}, {transform_indices = @transform_1, window_bounds = array<i64: 3, 16, 16>}, {pipeline_mode = #tpu.pipeline_mode<synchronous>, transform_indices = @transform_2, window_bounds = array<i64: 3, 64, 256>}, {pipeline_mode = #tpu.pipeline_mode<synchronous>, transform_indices = @transform_3, window_bounds = array<i64: 1, 256>}, {transform_indices = @transform_4, window_bounds = array<i64: 1, 16, 256>}]} {
    %c0 = arith.constant 0 : index
    %c0_0 = arith.constant 0 : index
    %c0_1 = arith.constant 0 : index
    %0 = vector.load %arg2[%c0, %c0_0, %c0_1] : memref<1x16x64xf32, #tpu.memory_space<vmem>>, vector<1x16x64xf32>
    %1 = vector.shape_cast %0 : vector<1x16x64xf32> to vector<16x64xf32>
    %c0_2 = arith.constant 0 : index
    %c0_3 = arith.constant 0 : index
    %2 = vector.load %arg5[%c0_2, %c0_3] : memref<1x256xf32, #tpu.memory_space<vmem>>, vector<1x256xf32>
    %3 = vector.shape_cast %2 : vector<1x256xf32> to vector<1x256xf32>
    %4 = vector.broadcast %3 : vector<1x256xf32> to vector<16x256xf32>
    %c0_4 = arith.constant 0 : index
    %c0_5 = arith.constant 0 : index
    %c0_6 = arith.constant 0 : index
    %5 = vector.load %arg3[%c0_4, %c0_5, %c0_6] : memref<3x16x16xf32, #tpu.memory_space<vmem>>, vector<1x16x16xf32>
    %6 = vector.shape_cast %5 : vector<1x16x16xf32> to vector<16x16xf32>
    %cst = arith.constant dense<0.000000e+00> : vector<16x64xf32>
    %7 = tpu.matmul %6, %1, %cst {dimension_numbers = #tpu.dot_dimension_numbers<[1], [0], [0], [1], [0, 0, 1, 1], [], []>} : vector<16x16xf32>, vector<16x64xf32>, vector<16x64xf32> -> vector<16x64xf32>
    %c0_7 = arith.constant 0 : index
    %c0_8 = arith.constant 0 : index
    %c0_9 = arith.constant 0 : index
    %8 = vector.load %arg4[%c0_7, %c0_8, %c0_9] : memref<3x64x256xf32, #tpu.memory_space<vmem>>, vector<1x64x256xf32>
    %9 = vector.shape_cast %8 : vector<1x64x256xf32> to vector<64x256xf32>
    %cst_10 = arith.constant dense<0.000000e+00> : vector<16x256xf32>
    %10 = tpu.matmul %7, %9, %cst_10 {dimension_numbers = #tpu.dot_dimension_numbers<[1], [0], [0], [1], [0, 0, 1, 1], [], []>} : vector<16x64xf32>, vector<64x256xf32>, vector<16x256xf32> -> vector<16x256xf32>
    %11 = arith.addf %4, %10 : vector<16x256xf32>
    %c1 = arith.constant 1 : index
    %c0_11 = arith.constant 0 : index
    %c0_12 = arith.constant 0 : index
    %12 = vector.load %arg3[%c1, %c0_11, %c0_12] : memref<3x16x16xf32, #tpu.memory_space<vmem>>, vector<1x16x16xf32>
    %13 = vector.shape_cast %12 : vector<1x16x16xf32> to vector<16x16xf32>
    %cst_13 = arith.constant dense<0.000000e+00> : vector<16x64xf32>
    %14 = tpu.matmul %13, %1, %cst_13 {dimension_numbers = #tpu.dot_dimension_numbers<[1], [0], [0], [1], [0, 0, 1, 1], [], []>} : vector<16x16xf32>, vector<16x64xf32>, vector<16x64xf32> -> vector<16x64xf32>
    %c1_14 = arith.constant 1 : index
    %c0_15 = arith.constant 0 : index
    %c0_16 = arith.constant 0 : index
    %15 = vector.load %arg4[%c1_14, %c0_15, %c0_16] : memref<3x64x256xf32, #tpu.memory_space<vmem>>, vector<1x64x256xf32>
    %16 = vector.shape_cast %15 : vector<1x64x256xf32> to vector<64x256xf32>
    %cst_17 = arith.constant dense<0.000000e+00> : vector<16x256xf32>
    %17 = tpu.matmul %14, %16, %cst_17 {dimension_numbers = #tpu.dot_dimension_numbers<[1], [0], [0], [1], [0, 0, 1, 1], [], []>} : vector<16x64xf32>, vector<64x256xf32>, vector<16x256xf32> -> vector<16x256xf32>
    %18 = arith.addf %11, %17 : vector<16x256xf32>
    %c2 = arith.constant 2 : index
    %c0_18 = arith.constant 0 : index
    %c0_19 = arith.constant 0 : index
    %19 = vector.load %arg3[%c2, %c0_18, %c0_19] : memref<3x16x16xf32, #tpu.memory_space<vmem>>, vector<1x16x16xf32>
    %20 = vector.shape_cast %19 : vector<1x16x16xf32> to vector<16x16xf32>
    %cst_20 = arith.constant dense<0.000000e+00> : vector<16x64xf32>
    %21 = tpu.matmul %20, %1, %cst_20 {dimension_numbers = #tpu.dot_dimension_numbers<[1], [0], [0], [1], [0, 0, 1, 1], [], []>} : vector<16x16xf32>, vector<16x64xf32>, vector<16x64xf32> -> vector<16x64xf32>
    %c2_21 = arith.constant 2 : index
    %c0_22 = arith.constant 0 : index
    %c0_23 = arith.constant 0 : index
    %22 = vector.load %arg4[%c2_21, %c0_22, %c0_23] : memref<3x64x256xf32, #tpu.memory_space<vmem>>, vector<1x64x256xf32>
    %23 = vector.shape_cast %22 : vector<1x64x256xf32> to vector<64x256xf32>
    %cst_24 = arith.constant dense<0.000000e+00> : vector<16x256xf32>
    %24 = tpu.matmul %21, %23, %cst_24 {dimension_numbers = #tpu.dot_dimension_numbers<[1], [0], [0], [1], [0, 0, 1, 1], [], []>} : vector<16x64xf32>, vector<64x256xf32>, vector<16x256xf32> -> vector<16x256xf32>
    %25 = arith.addf %18, %24 : vector<16x256xf32>
    %cst_25 = arith.constant 0.000000e+00 : f32
    %26 = vector.broadcast %cst_25 : f32 to vector<16x256xf32>
    %27 = arith.cmpf oge, %25, %26 : vector<16x256xf32>
    %cst_26 = arith.constant 0.00999999977 : f32
    %28 = vector.broadcast %cst_26 : f32 to vector<16x256xf32>
    %29 = arith.mulf %28, %25 : vector<16x256xf32>
    %30 = arith.select %27, %25, %29 : vector<16x256xi1>, vector<16x256xf32>
    %c0_27 = arith.constant 0 : index
    %c0_28 = arith.constant 0 : index
    %c0_29 = arith.constant 0 : index
    %31 = vector.load %arg6[%c0_27, %c0_28, %c0_29] : memref<1x16x256xf32, #tpu.memory_space<vmem>>, vector<1x16x256xf32>
    %32 = vector.shape_cast %31 : vector<1x16x256xf32> to vector<16x256xf32>
    %33 = vector.shape_cast %30 : vector<16x256xf32> to vector<1x16x256xf32>
    tpu.vector_store %arg6[%c0_27, %c0_28, %c0_29], %33 {strides = array<i32>} : memref<1x16x256xf32, #tpu.memory_space<vmem>>, vector<1x16x256xf32>,
    return
  }
  func.func @transform_0(%arg0: i32, %arg1: i32) -> (i32, i32, i32) {
    %c0_i32 = arith.constant 0 : i32
    %c0_i32_0 = arith.constant 0 : i32
    %c0_i32_1 = arith.constant 0 : i32
    return %arg0, %c0_i32, %c0_i32_0 : i32, i32, i32
  }
  func.func @transform_1(%arg0: i32, %arg1: i32) -> (i32, i32, i32) {
    %c0_i32 = arith.constant 0 : i32
    %c0_i32_0 = arith.constant 0 : i32
    %c0_i32_1 = arith.constant 0 : i32
    return %c0_i32, %arg1, %c0_i32_0 : i32, i32, i32
  }
  func.func @transform_2(%arg0: i32, %arg1: i32) -> (i32, i32, i32) {
    %c0_i32 = arith.constant 0 : i32
    %c0_i32_0 = arith.constant 0 : i32
    %c0_i32_1 = arith.constant 0 : i32
    %c0_i32_2 = arith.constant 0 : i32
    return %c0_i32, %c0_i32_0, %c0_i32_1 : i32, i32, i32
  }
  func.func @transform_3(%arg0: i32, %arg1: i32) -> (i32, i32) {
    %c0_i32 = arith.constant 0 : i32
    %c0_i32_0 = arith.constant 0 : i32
    %c0_i32_1 = arith.constant 0 : i32
    return %c0_i32, %c0_i32_0 : i32, i32
  }
  func.func @transform_4(%arg0: i32, %arg1: i32) -> (i32, i32, i32) {
    %c0_i32 = arith.constant 0 : i32
    %c0_i32_0 = arith.constant 0 : i32
    return %arg0, %arg1, %c0_i32 : i32, i32, i32
  }
}

module attributes {stable_mosaic.version = 11 : i64} {
  func.func @_fused_upsample_conv_kernel(%arg0: i32, %arg1: i32, %arg2: memref<1x16x64xf32, #tpu.memory_space<vmem>>, %arg3: memref<3x16x16xf32, #tpu.memory_space<vmem>>, %arg4: memref<3x64x256xf32, #tpu.memory_space<vmem>>, %arg5: memref<1x256xf32, #tpu.memory_space<vmem>>, %arg6: memref<1x16x256xf32, #tpu.memory_space<vmem>>) attributes {dimension_semantics = [#tpu.dimension_semantics<parallel>, #tpu.dimension_semantics<parallel>], iteration_bounds = array<i64: 2, 2>, scalar_prefetch = 0 : i64, scratch_operands = 0 : i64, tpu.core_type = #tpu.core_type<tc>, window_params = [{transform_indices = @transform_0, window_bounds = array<i64: 1, 16, 64>}, {transform_indices = @transform_1, window_bounds = array<i64: 3, 16, 16>}, {pipeline_mode = #tpu.pipeline_mode<synchronous>, transform_indices = @transform_2, window_bounds = array<i64: 3, 64, 256>}, {pipeline_mode = #tpu.pipeline_mode<synchronous>, transform_indices = @transform_3, window_bounds = array<i64: 1, 256>}, {transform_indices = @transform_4, window_bounds = array<i64: 1, 16, 256>}]} {
    %c0 = arith.constant 0 : index
    %c0_0 = arith.constant 0 : index
    %c0_1 = arith.constant 0 : index
    %0 = vector.load %arg2[%c0, %c0_0, %c0_1] : memref<1x16x64xf32, #tpu.memory_space<vmem>>, vector<1x16x64xf32>
    %1 = vector.shape_cast %0 : vector<1x16x64xf32> to vector<16x64xf32>
    %c0_2 = arith.constant 0 : index
    %c0_3 = arith.constant 0 : index
    %2 = vector.load %arg5[%c0_2, %c0_3] : memref<1x256xf32, #tpu.memory_space<vmem>>, vector<1x256xf32>
    %3 = vector.shape_cast %2 : vector<1x256xf32> to vector<1x256xf32>
    %4 = vector.broadcast %3 : vector<1x256xf32> to vector<16x256xf32>
    %c0_4 = arith.constant 0 : index
    %c0_5 = arith.constant 0 : index
    %c0_6 = arith.constant 0 : index
    %5 = vector.load %arg3[%c0_4, %c0_5, %c0_6] : memref<3x16x16xf32, #tpu.memory_space<vmem>>, vector<1x16x16xf32>
    %6 = vector.shape_cast %5 : vector<1x16x16xf32> to vector<16x16xf32>
    %cst = arith.constant dense<0.000000e+00> : vector<16x64xf32>
    %7 = tpu.matmul %6, %1, %cst {dimension_numbers = #tpu.dot_dimension_numbers<[1], [0], [0], [1], [0, 0, 1, 1], [], []>} : vector<16x16xf32>, vector<16x64xf32>, vector<16x64xf32> -> vector<16x64xf32>
    %c0_7 = arith.constant 0 : index
    %c0_8 = arith.constant 0 : index
    %c0_9 = arith.constant 0 : index
    %8 = vector.load %arg4[%c0_7, %c0_8, %c0_9] : memref<3x64x256xf32, #tpu.memory_space<vmem>>, vector<1x64x256xf32>
    %9 = vector.shape_cast %8 : vector<1x64x256xf32> to vector<64x256xf32>
    %cst_10 = arith.constant dense<0.000000e+00> : vector<16x256xf32>
    %10 = tpu.matmul %7, %9, %cst_10 {dimension_numbers = #tpu.dot_dimension_numbers<[1], [0], [0], [1], [0, 0, 1, 1], [], []>} : vector<16x64xf32>, vector<64x256xf32>, vector<16x256xf32> -> vector<16x256xf32>
    %11 = arith.addf %4, %10 : vector<16x256xf32>
    %c1 = arith.constant 1 : index
    %c0_11 = arith.constant 0 : index
    %c0_12 = arith.constant 0 : index
    %12 = vector.load %arg3[%c1, %c0_11, %c0_12] : memref<3x16x16xf32, #tpu.memory_space<vmem>>, vector<1x16x16xf32>
    %13 = vector.shape_cast %12 : vector<1x16x16xf32> to vector<16x16xf32>
    %cst_13 = arith.constant dense<0.000000e+00> : vector<16x64xf32>
    %14 = tpu.matmul %13, %1, %cst_13 {dimension_numbers = #tpu.dot_dimension_numbers<[1], [0], [0], [1], [0, 0, 1, 1], [], []>} : vector<16x16xf32>, vector<16x64xf32>, vector<16x64xf32> -> vector<16x64xf32>
    %c1_14 = arith.constant 1 : index
    %c0_15 = arith.constant 0 : index
    %c0_16 = arith.constant 0 : index
    %15 = vector.load %arg4[%c1_14, %c0_15, %c0_16] : memref<3x64x256xf32, #tpu.memory_space<vmem>>, vector<1x64x256xf32>
    %16 = vector.shape_cast %15 : vector<1x64x256xf32> to vector<64x256xf32>
    %cst_17 = arith.constant dense<0.000000e+00> : vector<16x256xf32>
    %17 = tpu.matmul %14, %16, %cst_17 {dimension_numbers = #tpu.dot_dimension_numbers<[1], [0], [0], [1], [0, 0, 1, 1], [], []>} : vector<16x64xf32>, vector<64x256xf32>, vector<16x256xf32> -> vector<16x256xf32>
    %18 = arith.addf %11, %17 : vector<16x256xf32>
    %c2 = arith.constant 2 : index
    %c0_18 = arith.constant 0 : index
    %c0_19 = arith.constant 0 : index
    %19 = vector.load %arg3[%c2, %c0_18, %c0_19] : memref<3x16x16xf32, #tpu.memory_space<vmem>>, vector<1x16x16xf32>
    %20 = vector.shape_cast %19 : vector<1x16x16xf32> to vector<16x16xf32>
    %cst_20 = arith.constant dense<0.000000e+00> : vector<16x64xf32>
    %21 = tpu.matmul %20, %1, %cst_20 {dimension_numbers = #tpu.dot_dimension_numbers<[1], [0], [0], [1], [0, 0, 1, 1], [], []>} : vector<16x16xf32>, vector<16x64xf32>, vector<16x64xf32> -> vector<16x64xf32>
    %c2_21 = arith.constant 2 : index
    %c0_22 = arith.constant 0 : index
    %c0_23 = arith.constant 0 : index
    %22 = vector.load %arg4[%c2_21, %c0_22, %c0_23] : memref<3x64x256xf32, #tpu.memory_space<vmem>>, vector<1x64x256xf32>
    %23 = vector.shape_cast %22 : vector<1x64x256xf32> to vector<64x256xf32>
    %cst_24 = arith.constant dense<0.000000e+00> : vector<16x256xf32>
    %24 = tpu.matmul %21, %23, %cst_24 {dimension_numbers = #tpu.dot_dimension_numbers<[1], [0], [0], [1], [0, 0, 1, 1], [], []>} : vector<16x64xf32>, vector<64x256xf32>, vector<16x256xf32> -> vector<16x256xf32>
    %25 = arith.addf %18, %24 : vector<16x256xf32>
    %cst_25 = arith.constant 0.000000e+00 : f32
    %26 = vector.broadcast %cst_25 : f32 to vector<16x256xf32>
    %27 = arith.cmpf oge, %25, %26 : vector<16x256xf32>
    %cst_26 = arith.constant 0.00999999977 : f32
    %28 = vector.broadcast %cst_26 : f32 to vector<16x256xf32>
    %29 = arith.mulf %28, %25 : vector<16x256xf32>
    %30 = arith.select %27, %25, %29 : vector<16x256xi1>, vector<16x256xf32>
    %c0_27 = arith.constant 0 : index
    %c0_28 = arith.constant 0 : index
    %c0_29 = arith.constant 0 : index
    %31 = vector.load %arg6[%c0_27, %c0_28, %c0_29] : memref<1x16x256xf32, #tpu.memory_space<vmem>>, vector<1x16x256xf32>
    %32 = vector.shape_cast %31 : vector<1x16x256xf32> to vector<16x256xf32>
    %33 = vector.shape_cast %30 : vector<16x256xf32> to vector<1x16x256xf32>
    tpu.vector_store %arg6[%c0_27, %c0_28, %c0_29], %33 {strides = array<i32>} : memref<1x16x256xf32, #tpu.memory_space<vmem>>, vector<1x16x256xf32>,
    return
  }
  func.func @transform_0(%arg0: i32, %arg1: i32) -> (i32, i32, i32) {
    %c0_i32 = arith.constant 0 : i32
    %c0_i32_0 = arith.constant 0 : i32
    %c0_i32_1 = arith.constant 0 : i32
    return %arg0, %c0_i32, %c0_i32_0 : i32, i32, i32
  }
  func.func @transform_1(%arg0: i32, %arg1: i32) -> (i32, i32, i32) {
    %c0_i32 = arith.constant 0 : i32
    %c0_i32_0 = arith.constant 0 : i32
    %c0_i32_1 = arith.constant 0 : i32
    return %c0_i32, %arg1, %c0_i32_0 : i32, i32, i32
  }
  func.func @transform_2(%arg0: i32, %arg1: i32) -> (i32, i32, i32) {
    %c0_i32 = arith.constant 0 : i32
    %c0_i32_0 = arith.constant 0 : i32
    %c0_i32_1 = arith.constant 0 : i32
    %c0_i32_2 = arith.constant 0 : i32
    return %c0_i32, %c0_i32_0, %c0_i32_1 : i32, i32, i32
  }
  func.func @transform_3(%arg0: i32, %arg1: i32) -> (i32, i32) {
    %c0_i32 = arith.constant 0 : i32
    %c0_i32_0 = arith.constant 0 : i32
    %c0_i32_1 = arith.constant 0 : i32
    return %c0_i32, %c0_i32_0 : i32, i32
  }
  func.func @transform_4(%arg0: i32, %arg1: i32) -> (i32, i32, i32) {
    %c0_i32 = arith.constant 0 : i32
    %c0_i32_0 = arith.constant 0 : i32
    return %arg0, %arg1, %c0_i32 : i32, i32, i32
  }
}

</mosaic_0001>

<bundles_post_ra>
// kernel: tpu_custom_call.1
= control target key start
LH: loop header
LB: loop body
LE: loop exit
PB: predicated region body
PF: predicated region fallthrough
CT: control target
= control target key end

     0   :  { %9 = vsyncpa [#allocation4], 0  ;;  %s1614_s0 = inlined_call_operand.vmem [shape: f32[2,16,64], index: 0, kind: input, shape index: {}]   ;;  %s1615_s1 = inlined_call_operand.vmem [shape: f32[3,32,16], index: 1, kind: input, shape index: {}]   ;;  %s1616_s2 = inlined_call_operand.hbm [shape: f32[3,64,256], index: 2, kind: input, shape index: {}]   ;;  %s1617_s3 = inlined_call_operand.vmem [shape: f32[1,256], index: 3, kind: input, shape index: {}]   ;;  %s1618_s4 = inlined_call_operand.hbm [shape: f32[2,32,256], index: 4, kind: output, shape index: {}]  }
   0x1   :  { %10 = vsyncpa [#allocation5], 0 }
   0x2   :  { %12 = vsyncpa [#allocation5 + $0x1], 0  ;;  %s1368_s15 = smov 0   ;;  %s1370_s16 = smov 0  }
   0x3   :  { %s1372_s17 = smov 0   ;;  %s1374_s18 = smov 0  }
   0x4   :  { %s1376_s19 = smov 0   ;;  %s1378_s20 = smov 0  }
   0x5   :  { %s1380_s21 = smov 0   ;;  %s1382_s22 = smov 0  }
   0x6   :  { %s1384_s23 = smov 0   ;;  %s1386_s24 = smov 0  }
   0x7 LB: > { %1623 = sst [smem:[#allocation9_spill]] %s1330_s23  ;;  %s1020_s25 = sadd.s32 4294967295, %s1334_s24   ;;  %s1334_s24 = sphi %s1386_s24, %s18_s24   ;;  %s1330_s23 = sphi %s1384_s23, %s1637_s23   ;;  %s1326_s22 = sphi %s1382_s22, %s1644_s22   ;;  %s1322_s21 = sphi %s1380_s21, %s1635_s21   ;;  %s1318_s20 = sphi %s1378_s20, %s1643_s20   ;;  %s1314_s19 = sphi %s1376_s19, %s1642_s19   ;;  %s1310_s18 = sphi %s1374_s18, %s1641_s18   ;;  %s1306_s17 = sphi %s1372_s17, %s1640_s17   ;;  %s1302_s16 = sphi %s1370_s16, %s1639_s16   ;;  %s1298_s15 = sphi %s1368_s15, %s1638_s15  }
   0x8   : > { %s1021_s26 = sadd.s32 4294967294, %s1334_s24   ;;  %s27_s27 = sadd.s32 1, %s1326_s22 }
   0x9   : > { %s30_s28 = sadd.s32 1, %s1330_s23  ;;  %p28_p0 = scmp.ge.s32.totalorder %s27_s27, 2 }
   0xa   : > { %s63_s29 = sadd.s32 1, %s1314_s19  ;;  %p70_p1 = scmp.ne.s32.totalorder %s1314_s19, %s1310_s18 }
   0xb   : > { %p71_p2 = scmp.eq.s32.totalorder %s1334_s24, 0  ;;  %s1646_s27 = smov (%p28_p0, %s27_s27), 0 }
   0xc   : > { %1624 = sst [smem:[#allocation10_spill]] %s1646_s27  ;;  %s1648_s28 = smov (!%p28_p0, %s30_s28), %s1330_s23 }
   0xd   : > { %s60_s30 = ssub.s32 %s1326_s22, %s1646_s27  ;;  %p1431_p3 = por %p71_p2, %p70_p1 }
   0xe   : > { %p32_p4 = scmp.ge.s32.totalorder %s1648_s28, 2  ;;  %p61_p5 = scmp.eq.s32.totalorder %s60_s30, 0 }
   0xf   : > { %s133_s6 = sadd.s32 1, %s1306_s17  ;;  %p143_p6 = scmp.ne.s32.totalorder %s1306_s17, %s1302_s16 }
  0x10   : > { %s1650_s28 = smov (%p32_p4, %s1648_s28), 0  ;;  %p144_p7 = scmp.eq.s32.totalorder %s1020_s25, 3 }
  0x11   : > { %1626 = sst [smem:[#allocation11_spill]] %s1650_s28  ;;  %s128_s8 = ssub.s32 %s1330_s23, %s1650_s28 }
  0x12   : > { %s1441_s7 = scalar_select %p61_p5, %s1314_s19, %s63_s29  }
  0x13   : > { %s130_s9 = sor.u32 %s128_s8, %s60_s30  ;;  %p149_p8 = scmp.ne.s32.totalorder %s1302_s16, %s1298_s15 }
  0x14   : > { %1627 = sst [smem:[#allocation12_spill]] %s1441_s7  ;;  %p131_p9 = scmp.eq.s32.totalorder %s130_s9, 0 }
  0x15   : > { %p1447_p10 = por %p144_p7, %p143_p6  ;;  %p150_p11 = scmp.eq.s32.totalorder %s1021_s26, 3 }
  0x16   : > { %p1022_p12 = scmp.ge.s32.totalorder %s1334_s24, 1  ;;  %p157_p0 = scmp.lt.s32.totalorder %s1334_s24, 5 }
  0x17   : > { %s1628_s10 = scalar_select %p1447_p10, 1, 0 }
  0x18   : > { %s1453_s11 = scalar_select %p131_p9, %s1306_s17, %s133_s6  }
  0x19   : > { %p1455_p13 = por %p150_p11, %p149_p8  ;;  %p1460_p1 = scmp.eq.s32.totalorder %s1020_s25, 0 }
  0x1a   : > { %p1464_p2 = pnand %p1022_p12, %p157_p0  ;;  %s1336_s29 = smov [#allocation3]  }
  0x1b   : > { %s1629_s12 = scalar_select %p1455_p13, 1, 0 }
  0x1c   : > { %s169_s26 = sshll.u32 %s1336_s29, 4  ;;  %p1099_p4 = pneg %p1464_p2  ;;  %s170_s26 = int_to_ptr.vmem [resolvable:$true] %s169_s26 }
  0x1d   : > { %s1207_s30 = scalar_lea.vmem %s170_s26, 6144  ;;  %p1215_p11 = scmp.lt.s32.totalorder %s170_s26, %s170_s26 }
  0x1e   : > { %p1100_p5 = pnand %p1460_p1, %p1099_p4  ;;  %p1208_p7 = scmp.ne.s32.totalorder %s170_s26, %s1207_s30 }
  0x1f   : > { %p1216_p13 = scmp.lt.s32.totalorder %s1207_s30, %s1207_s30 }
  0x20   : > { %p1198_p6 = pneg %p1100_p5 }
  0x21   : > { %p1217_p10 = por %p1216_p13, %p1215_p11 }
  0x22   : > { %p1210_p8 = pnand %p1208_p7, %p1198_p6 }
  0x24   : > { %p1211_p9 = pneg %p1210_p8 }
  0x26   : > { %p1218_p12 = pnand %p1217_p10, %p1211_p9 }
  0x28   : > { %1221 = shalt.err (!%p1218_p12)
}
  0x29   : > { %s1337_s25 = smov 256   ;;  %s1338_s6 = smov 16  }
  0x2a   : > { %1102 = dma.hbm_to_vmem [thread:$0]  (!%p1100_p5), %s1616_s2, 6144, %s170_s26, [#allocation4], %s1337_s25, %s1337_s25, %s1338_s6  }
  0x2b   : > { %p1024_p0 = scmp.ge.s32.totalorder %s1334_s24, 4 }
  0x2d   : > { %182 = sbr.rel (%p1024_p0) target bundleno = 57 (0x39), region = 24 }
  0x32   : > { %193 = sbr.rel (!%p1431_p3) target bundleno = 57 (0x39), region = 32  ;;  %s195_s29 = sand.u32 (%p1431_p3), 1, %s1314_s19  }
  0x33   : > { %s1055_s28 = sshll.u32 (%p1431_p3), %s1326_s22, 4  ;;  %s1091_s30 = smul.u32 (%p1431_p3), 48, %s195_s29 }
  0x34   : > { %s200_s7 = scalar_lea.vmem (%p1431_p3), %s1615_s1, %s1055_s28 }
  0x35   : > { %v239_v0 = vld [vmem:[%s200_s7] sm:$0xff] (%p1431_p3)  ;;  %v241_v1 = vld [vmem:[%s200_s7 + $0x8] sm:$0xff] (%p1431_p3)  ;;  %s197_s26 = scalar_lea.vmem (%p1431_p3), [#allocation2], %s1091_s30 }
  0x36   : > { %v243_v2 = vld [vmem:[%s200_s7 + $0x20] sm:$0xff] (%p1431_p3)  ;;  %v245_v3 = vld [vmem:[%s200_s7 + $0x28] sm:$0xff] (%p1431_p3)  ;;  %240 = vst [vmem:[%s197_s26] sm:$0xff] (%p1431_p3), %v239_v0  ;;  %242 = vst [vmem:[%s197_s26 + $0x8] sm:$0xff] (%p1431_p3), %v241_v1 }
  0x37   : > { %v247_v4 = vld [vmem:[%s200_s7 + $0x40] sm:$0xff]  ;;  %v249_v5 = vld [vmem:[%s200_s7 + $0x48] sm:$0xff]  ;;  %244 = vst [vmem:[%s197_s26 + $0x10] sm:$0xff] %v243_v2  ;;  %246 = vst [vmem:[%s197_s26 + $0x18] sm:$0xff] %v245_v3 }
  0x38   : > { %248 = vst [vmem:[%s197_s26 + $0x20] sm:$0xff] %v247_v4  ;;  %250 = vst [vmem:[%s197_s26 + $0x28] sm:$0xff] %v249_v5 }
  0x39 PF: > { %259 = sbr.rel (%p1464_p2) target bundleno = 706 (0x2c2), region = 70  ;;  %s262_s23 = sand.u32 (!%p1464_p2), 1, %s1310_s18  }
  0x3a   : > { %s1092_s27 = smul.u32 (!%p1464_p2), 48, %s262_s23 }
  0x3c   : > { %s1486_s28 = scalar_lea.vmem (!%p1464_p2), [#allocation2], %s1092_s27 }
  0x3e   : > { %1289 = dma.done.wait (%p1460_p1), [#allocation4], 6144  }
  0x3f   : > { %1291 = vsyncadd (%p1460_p1), [#allocation4], 4294961152  ;;  %p296_p3 = scmp.lt.s32.totalorder %s1322_s21, 1  ;;  %vm319_vm0 = vcmask 130048   ;;  %v317_v8 = vld [vmem:[%s1486_s28] sm:$0xff]  ;;  %v318_v9 = vld [vmem:[%s1486_s28 + $0x8] sm:$0xff] }
  0x40   : > { %1074 = vmatprep.mubr.msk.f32.mxu1 %vm319_vm0, %v317_v8  ;;  %v416_v10 = vld [vmem:[#allocation3 + $0x78] sm:$0xff]  ;;  %v415_v11 = vld [vmem:[#allocation3 + $0x70] sm:$0xff]  ;;  %v414_v12 = vld [vmem:[#allocation3 + $0x68] sm:$0xff]  ;;  %v1339_v26 = vmov 0.0   ;;  %vm417_vm1 = vcmask 523264   ;;  %s293_s8 = sand.u32 1, %s1302_s16  }
  0x41   : > { %s297_s5 = scalar_select %p296_p3, %s1322_s21, 1  ;;  %v413_v13 = vld [vmem:[#allocation3 + $0x60] sm:$0xff]  ;;  %v412_v14 = vld [vmem:[#allocation3 + $0x58] sm:$0xff]  ;;  %v411_v15 = vld [vmem:[#allocation3 + $0x50] sm:$0xff]  ;;  %676 = vmatprep.mubr.f32.mxu0 %v1339_v26 }
  0x42   : > { %v410_v16 = vld [vmem:[#allocation3 + $0x48] sm:$0xff]  ;;  %v409_v17 = vld [vmem:[#allocation3 + $0x40] sm:$0xff]  ;;  %v408_v18 = vld [vmem:[#allocation3 + $0x38] sm:$0xff]  ;;  %s1029_s9 = sshll.u32 %s293_s8, 5  ;;  %s1057_s29 = sshll.u32 %s1318_s20, 2 }
  0x43   : > { %s1056_s7 = sshll.u32 %s297_s5, 4  ;;  %v407_v19 = vld [vmem:[#allocation3 + $0x30] sm:$0xff]  ;;  %v406_v20 = vld [vmem:[#allocation3 + $0x28] sm:$0xff]  ;;  %v405_v21 = vld [vmem:[#allocation3 + $0x20] sm:$0xff]  ;;  %s1051_s30 = sshll.u32 %s1322_s21, 3 }
  0x44   : > { %s300_s6 = scalar_lea.vmem %s1614_s0, %s1056_s7  ;;  %v404_v22 = vld [vmem:[#allocation3 + $0x18] sm:$0xff]  ;;  %v403_v23 = vld [vmem:[#allocation3 + $0x10] sm:$0xff]  ;;  %v402_v24 = vld [vmem:[#allocation3 + $0x8] sm:$0xff]  ;;  %s911_s26 = sadd.s32 %s1057_s29, %s1051_s30 }
  0x45   : > { %v1497_v6 = vld [vmem:[%s300_s6 + $0x8] sm:$0xff]  ;;  %v1499_v7 = vld [vmem:[%s300_s6] sm:$0xff]  ;;  %v605_v27 = vld [vmem:[#allocation3 + $0xf8] sm:$0xff]  ;;  %s295_s23 = scalar_lea.vmem [#allocation6], %s1029_s9  ;;  %s1052_s21 = sshll.u32 %s911_s26, 7 }
  0x46   : > { %1070 = vmatprep.subr.mxu1 %v1497_v6  ;;  %v401_v25 = vld [vmem:[#allocation3] sm:$0xff]  ;;  %v604_v28 = vld [vmem:[#allocation3 + $0xf0] sm:$0xff]  ;;  %v603_v29 = vld [vmem:[#allocation3 + $0xe8] sm:$0xff]  ;;  %628 = vmatprep.subr.mxu0 %v605_v27  ;;  %s914_s20 = sshll.u32 %s295_s23, 4  ;;  %s1553_s5 = scalar_lea.hbm %s1618_s4, %s1052_s21  ;;  %s1548_s20 = int_to_ptr.vmem [resolvable:$true] %s914_s20 }
  0x47   : > { %1071 = vmatpush3.msra.mxu1 %v1497_v6  ;;  %v602_v30 = vld [vmem:[#allocation3 + $0xe0] sm:$0xff]  ;;  %629 = vmatpush1.msra.mxu0 %v604_v28  ;;  %v601_v31 = vld [vmem:[#allocation3 + $0xd8] sm:$0xff]  ;;  %v600_v32 = vld [vmem:[#allocation3 + $0xd0] sm:$0xff]  ;;  %s1557_s7 = scalar_lea.sflag [#allocation5], %s293_s8  ;;  %s1222_s14 = scalar_lea.vmem %s1548_s20, 512 }
  0x48   : > { %1072 = vmatprep.subr.mxu1 %v1499_v7  ;;  %630 = vmatprep.subr.mxu0 %v603_v29  ;;  %v1036_v35 = vld [vmem:[%s1486_s28 + $0x10] sm:$0xff]  ;;  %v1037_v36 = vld [vmem:[%s1486_s28 + $0x18] sm:$0xff]  ;;  %v1042_v37 = vld [vmem:[%s1486_s28 + $0x20] sm:$0xff]  ;;  %p1223_p10 = scmp.ne.s32.totalorder %s1548_s20, %s1222_s14  ;;  %p1632_p13 = scmp.ne.s32.totalorder %s1628_s10, 0 }
  0x49   : > { %1073 = vmatpush3.msra.mxu1 %v1499_v7  ;;  %631 = vmatpush1.msra.mxu0 %v602_v30  ;;  %v1043_v38 = vld [vmem:[%s1486_s28 + $0x28] sm:$0xff]  ;;  %v598_v40 = vld [vmem:[#allocation3 + $0xc0] sm:$0xff]  ;;  %v596_v42 = vld [vmem:[#allocation3 + $0xb0] sm:$0xff]  ;;  %s1340_s25 = smov [#allocation6]  }
  0x4a   : > { %1075 = vmatmul.mubr.msk.f32.vlgmr.msra.gmra.mxu1 %vm319_vm0, %v318_v9  ;;  %440 = vmatprep.subr.mxu1 %v416_v10  ;;  %v599_v39 = vld [vmem:[#allocation3 + $0xc8] sm:$0xff]  ;;  %v597_v41 = vld [vmem:[#allocation3 + $0xb8] sm:$0xff]  ;;  %v594_v44 = vld [vmem:[#allocation3 + $0xa0] sm:$0xff]  ;;  %v307_v9 = vlaneseq  ;;  %p1224_p1 = pnand %p1223_p10, %p1632_p13  ;;  %s1226_s6 = sshll.u32 %s1340_s25, 4  ;;  %s1227_s6 = int_to_ptr.vmem [resolvable:$false] %s1226_s6 }
  0x4b   : > { %441 = vmatpush1.msra.mxu1 %v415_v11  ;;  %488 = vmatprep.mubr.f32.mxu1 %v1339_v26  ;;  %v595_v43 = vld [vmem:[#allocation3 + $0xa8] sm:$0xff]  ;;  %v593_v45 = vld [vmem:[#allocation3 + $0x98] sm:$0xff]  ;;  %v592_v46 = vld [vmem:[#allocation3 + $0x90] sm:$0xff]  ;;  %s1228_s18 = scalar_lea.vmem %s1227_s6, 1024  ;;  %p1229_p4 = scmp.lt.s32.totalorder %s1548_s20, %s1227_s6 }
  0x4c   : > { %442 = vmatprep.subr.mxu1 %v414_v12  ;;  %632 = vmatprep.subr.mxu0 %v601_v31  ;;  %v591_v47 = vld [vmem:[#allocation3 + $0x88] sm:$0xff]  ;;  %v590_v48 = vld [vmem:[#allocation3 + $0x80] sm:$0xff]  ;;  %v793_v49 = vld [vmem:[#allocation3 + $0x178] sm:$0xff]  ;;  %v308_v10 = vshrl.u32 %v307_v9, 7  ;;  %p1225_p2 = pneg %p1224_p1  ;;  %p1230_p5 = scmp.lt.s32.totalorder %s1228_s18, %s1222_s14 }
  0x4d   : > { %443 = vmatpush1.msra.mxu1 %v413_v13  ;;  %633 = vmatpush1.msra.mxu0 %v600_v32  ;;  %v792_v55 = vld [vmem:[#allocation3 + $0x170] sm:$0xff]  ;;  %v791_v57 = vld [vmem:[#allocation3 + $0x168] sm:$0xff]  ;;  %v790_v58 = vld [vmem:[#allocation3 + $0x160] sm:$0xff] }
  0x4e   : > { %444 = vmatprep.subr.mxu1 %v412_v14  ;;  %634 = vmatprep.subr.mxu0 %v599_v39  ;;  %v789_v59 = vld [vmem:[#allocation3 + $0x158] sm:$0xff]  ;;  %v788_v60 = vld [vmem:[#allocation3 + $0x150] sm:$0xff]  ;;  %v787_v61 = vld [vmem:[#allocation3 + $0x148] sm:$0xff]  ;;  %v309_v12 = vsub.s32 0, %v308_v10  ;;  %p1231_p6 = por %p1230_p5, %p1229_p4 }
  0x4f   : > { %445 = vmatpush1.msra.mxu1 %v411_v15  ;;  %635 = vmatpush1.msra.mxu0 %v598_v40  ;;  %v786_v62 = vld [vmem:[#allocation3 + $0x140] sm:$0xff]  ;;  %v785_v63 = vld [vmem:[#allocation3 + $0x138] sm:$0xff]  ;;  %v784_v0 = vld [vmem:[#allocation3 + $0x130] sm:$0xff]  ;;  %v313_v15 = vsub.s32 1, %v308_v10 }
  0x50   : > { %446 = vmatprep.subr.mxu1 %v410_v16  ;;  %636 = vmatprep.subr.mxu0 %v597_v41  ;;  %v783_v1 = vld [vmem:[#allocation3 + $0x128] sm:$0xff]  ;;  %v782_v2 = vld [vmem:[#allocation3 + $0x120] sm:$0xff]  ;;  %v781_v3 = vld [vmem:[#allocation3 + $0x118] sm:$0xff]  ;;  %p1232_p7 = pnand %p1231_p6, %p1225_p2 }
  0x51   : > { %447 = vmatpush1.msra.mxu1 %v409_v17  ;;  %637 = vmatpush1.msra.mxu0 %v596_v42  ;;  %v780_v4 = vld [vmem:[#allocation3 + $0x110] sm:$0xff]  ;;  %v305_v13 = vld [vmem:[%s1617_s3] sm:$0x3] }
  0x52   : > { %448 = vmatprep.subr.mxu1 %v408_v18  ;;  %638 = vmatprep.subr.mxu0 %v595_v43  ;;  %v310_v16 = vrot.slane %v305_v13, %v309_v12  ;;  %v314_v18 = vrot.slane %v305_v13, %v313_v15 }
  0x53   : > { %449 = vmatpush1.msra.mxu1 %v407_v19  ;;  %639 = vmatpush1.msra.mxu0 %v594_v44 }
  0x54   : > { %450 = vmatprep.subr.mxu1 %v406_v20  ;;  %640 = vmatprep.subr.mxu0 %v593_v45 }
  0x55   : > { %451 = vmatpush1.msra.mxu1 %v405_v21  ;;  %641 = vmatpush1.msra.mxu0 %v592_v46 }
  0x56   : > { %452 = vmatprep.subr.mxu1 %v404_v22  ;;  %642 = vmatprep.subr.mxu0 %v591_v47 }
  0x57   : > { %453 = vmatpush1.msra.mxu1 %v403_v23  ;;  %643 = vmatpush1.msra.mxu0 %v590_v48 }
  0x58   : > { %454 = vmatprep.subr.mxu1 %v402_v24  ;;  %816 = vmatprep.subr.mxu0 %v793_v49 }
  0x59   : > { %455 = vmatpush1.msra.mxu1 %v401_v25 }
  0x5a   : > { %1077 = vmatprep.subr.mxu1 %v1497_v6 }
 0x10a   : > { %v1076_v33 = vpop.f32.mrf.mxu1 }
 0x10c   : > { %v392_v34 = vpop.f32.mrf.mxu1 }
 0x10d   : > { %1034 = vmatmul.mubr.msk.f32.vlgmr.msra.gmra.mxu1 %vm417_vm1, %v392_v34 }
 0x10e   : > { %1078 = vmatpush3.msra.mxu1 %v1497_v6  ;;  %494 = vmatprep.mubr.f32.mxu1 %v1339_v26 }
 0x10f   : > { %1079 = vmatprep.subr.mxu1 %v1499_v7 }
 0x110   : > { %1080 = vmatpush3.msra.mxu1 %v1499_v7 }
 0x111   : > { %1035 = vmatmul.mubr.msk.f32.gmra.mxu1 %vm417_vm1, %v1076_v33  ;;  %1084 = vmatprep.subr.mxu1 %v1497_v6 }
 0x112   : > { %1081 = vmatprep.mubr.msk.f32.mxu1 %vm319_vm0, %v1036_v35 }
 0x115   : > { %1082 = vmatmul.mubr.msk.f32.vlgmr.msra.gmra.mxu1 %vm319_vm0, %v1037_v36 }
 0x116   : > { %1085 = vmatpush3.msra.mxu1 %v1497_v6  ;;  %1088 = vmatprep.mubr.msk.f32.mxu1 %vm319_vm0, %v1042_v37  ;;  %v779_v6 = vld [vmem:[#allocation3 + $0x108] sm:$0xff] }
 0x117   : > { %1086 = vmatprep.subr.mxu1 %v1499_v7 }
 0x118   : > { %1087 = vmatpush3.msra.mxu1 %v1499_v7  ;;  %v778_v7 = vld [vmem:[#allocation3 + $0x100] sm:$0xff] }
 0x119   : > { %1089 = vmatmul.mubr.msk.f32.vlgmr.msra.gmra.mxu1 %vm319_vm0, %v1043_v38 }
 0x1cd   : > { %v490_v50 = vpop.f32.mrf.mxu1 }
 0x1ce   : > { %v501_v19 = vadd.f32 %v490_v50, %v310_v16 }
 0x1cf   : > { %v492_v51 = vpop.f32.mrf.mxu1 }
 0x1d0   : > { %v502_v21 = vadd.f32 %v492_v51, %v314_v18 }
 0x1d1   : > { %v496_v52 = vpop.f32.mrf.mxu1 }
 0x1d2   : > { %v503_v24 = vadd.f32 %v496_v52, %v310_v16 }
 0x1d3   : > { %v1530_v53 = vpop.f32.mrf.mxu1 }
 0x1d4   : > { %v504_v27 = vadd.f32 %v1530_v53, %v314_v18 }
 0x1d5   : > { %v1083_v54 = vpop.f32.mrf.mxu1 }
 0x1d7   : > { %v580_v56 = vpop.f32.mrf.mxu1 }
 0x1d8   : > { %1040 = vmatmul.mubr.msk.f32.vlgmr.msra.gmra.mxu0 %vm417_vm1, %v580_v56 }
 0x1d9   : > { %817 = vmatpush1.msra.mxu0 %v792_v55  ;;  %682 = vmatprep.mubr.f32.mxu0 %v1339_v26  ;;  %v1090_v5 = vpop.f32.mrf.mxu1 }
 0x1da   : > { %818 = vmatprep.subr.mxu0 %v791_v57 }
 0x1db   : > { %819 = vmatpush1.msra.mxu0 %v790_v58  ;;  %v768_v8 = vpop.f32.mrf.mxu1 }
 0x1dc   : > { %820 = vmatprep.subr.mxu0 %v789_v59  ;;  %1041 = vmatmul.mubr.msk.f32.gmra.mxu0 %vm417_vm1, %v1083_v54 }
 0x1dd   : > { %821 = vmatpush1.msra.mxu0 %v788_v60  ;;  %864 = vmatprep.mubr.f32.mxu0 %v1339_v26 }
 0x1de   : > { %822 = vmatprep.subr.mxu0 %v787_v61 }
 0x1df   : > { %823 = vmatpush1.msra.mxu0 %v786_v62 }
 0x1e0   : > { %824 = vmatprep.subr.mxu0 %v785_v63 }
 0x1e1   : > { %825 = vmatpush1.msra.mxu0 %v784_v0 }
 0x1e2   : > { %826 = vmatprep.subr.mxu0 %v783_v1 }
 0x1e3   : > { %827 = vmatpush1.msra.mxu0 %v782_v2 }
 0x1e4   : > { %828 = vmatprep.subr.mxu0 %v781_v3 }
 0x1e5   : > { %829 = vmatpush1.msra.mxu0 %v780_v4 }
 0x1e6   : > { %830 = vmatprep.subr.mxu0 %v779_v6 }
 0x1e7   : > { %831 = vmatpush1.msra.mxu0 %v778_v7 }
 0x1e8   : > { %1046 = vmatmul.mubr.msk.f32.vlgmr.msra.gmra.mxu0 %vm417_vm1, %v768_v8 }
 0x1e9   : > { %870 = vmatprep.mubr.f32.mxu0 %v1339_v26 }
 0x1ec   : > { %1047 = vmatmul.mubr.msk.f32.gmra.mxu0 %vm417_vm1, %v1090_v5 }
 0x298   : > { %v678_v11 = vpop.f32.mrf.mxu0 }
 0x299   : > { %v689_v22 = vadd.f32 %v678_v11, %v501_v19 }
 0x29a   : > { %v680_v14 = vpop.f32.mrf.mxu0 }
 0x29b   : > { %v690_v25 = vadd.f32 %v680_v14, %v502_v21 }
 0x29c   : > { %v684_v17 = vpop.f32.mrf.mxu0 }
 0x29d   : > { %v691_v29 = vadd.f32 %v684_v17, %v503_v24 }
 0x29e   : > { %v686_v20 = vpop.f32.mrf.mxu0 }
 0x29f   : > { %v692_v32 = vadd.f32 %v686_v20, %v504_v27 }
 0x2a8   : > { %v866_v23 = vpop.f32.mrf.mxu0 }
 0x2a9   : > { %v877_v26 = vadd.f32 %v866_v23, %v689_v22 }
 0x2aa   : > { %v868_v28 = vpop.f32.mrf.mxu0 }
 0x2ab   : > { %vm881_vm2 = vcmp.ge.f32.partialorder %v877_v26, 0.0  ;;  %v885_v30 = vmul.f32 0.01, %v877_v26  ;;  %v878_v31 = vadd.f32 %v868_v28, %v690_v25 }
 0x2ac   : > { %v872_v33 = vpop.f32.mrf.mxu0 }
 0x2ad   : > { %v889_v34 = vsel %vm881_vm2, %v877_v26, %v885_v30  ;;  %vm882_vm3 = vcmp.ge.f32.partialorder %v878_v31, 0.0  ;;  %v886_v35 = vmul.f32 0.01, %v878_v31  ;;  %v879_v36 = vadd.f32 %v872_v33, %v691_v29 }
 0x2ae   : > { %893 = vst [vmem:[%s295_s23] sm:$0xff] %v889_v34  ;;  %v874_v37 = vpop.f32.mrf.mxu0 }
 0x2af   : > { %v890_v38 = vsel %vm882_vm3, %v878_v31, %v886_v35  ;;  %vm883_vm4 = vcmp.ge.f32.partialorder %v879_v36, 0.0  ;;  %v887_v39 = vmul.f32 0.01, %v879_v36  ;;  %v880_v40 = vadd.f32 %v874_v37, %v692_v32 }
 0x2b0   : > { %894 = vst [vmem:[%s295_s23 + $0x8] sm:$0xff] %v890_v38 }
 0x2b1   : > { %v891_v41 = vsel %vm883_vm4, %v879_v36, %v887_v39  ;;  %vm884_vm5 = vcmp.ge.f32.partialorder %v880_v40, 0.0  ;;  %v888_v42 = vmul.f32 0.01, %v880_v40 }
 0x2b2   : > { %895 = vst [vmem:[%s295_s23 + $0x10] sm:$0xff] %v891_v41 }
 0x2b3   : > { %v892_v43 = vsel %vm884_vm5, %v880_v40, %v888_v42 }
 0x2b4   : > { %896 = vst [vmem:[%s295_s23 + $0x18] sm:$0xff] %v892_v43 }
 0x2b5   : > { %1235 = shalt.err (!%p1232_p7)
}
 0x2b6   : > { %s1236_s13 = scalar_lea.hbm %s1553_s5, 512  ;;  %s1240_s29 = scalar_lea.hbm %s1618_s4, 2048 }
 0x2b7   : > { %p1237_p8 = scmp.ne.s32.totalorder %s1553_s5, %s1236_s13  ;;  %p1241_p12 = scmp.lt.s32.totalorder %s1553_s5, %s1618_s4 }
 0x2b8   : > { %p1242_p0 = scmp.lt.s32.totalorder %s1240_s29, %s1236_s13 }
 0x2b9   : > { %p1238_p9 = pnand %p1237_p8, %p1632_p13 }
 0x2ba   : > { %p1243_p3 = por %p1242_p0, %p1241_p12 }
 0x2bb   : > { %p1239_p11 = pneg %p1238_p9 }
 0x2bd   : > { %p1244_p10 = pnand %p1243_p3, %p1239_p11 }
 0x2bf   : > { %1247 = shalt.err (!%p1244_p10)
}
 0x2c0   : > { %s1341_s23 = smov 256   ;;  %s1342_s21 = smov 16  }
 0x2c1   : > { %1097 = dma.vmem_to_hbm [thread:$0]  (%p1632_p13), %s1548_s20, 512, %s1553_s5, %s1557_s7, %s1341_s23, %s1341_s23, %s1342_s21  }
 0x2c2 PF: > { %p1109_p1 = scmp.ge.s32.totalorder %s1334_s24, 2  ;;  %s929_s27 = sand.u32 1, %s1298_s15  }
 0x2c3   : > { %p1633_p2 = scmp.ne.s32.totalorder %s1629_s12, 0  ;;  %s930_s28 = scalar_lea.sflag [#allocation5], %s929_s27 }
 0x2c5   : > { %p1104_p4 = pnand %p1109_p1, %p1633_p2 }
 0x2c7   : > { %p1105_p5 = pneg %p1104_p4 }
 0x2c9   : > { %1293 = dma.done.wait (%p1105_p5), %s930_s28, 512  }
 0x2ca   : > { %1295 = vsyncadd (%p1105_p5), %s930_s28, 4294966784  ;;  %s18_s24 = sadd.s32 1, %s1334_s24   ;;  %s1634_s10 = sld [smem:[#allocation12_spill]] }
 0x2cb   : > { %p15_p6 = scmp.ge.s32.totalorder %s18_s24, 6   ;;  %s1635_s21 = sld [smem:[#allocation9_spill]] }
 0x2cc   : > { %s1636_s5 = sld [smem:[#allocation10_spill]]  ;;  %s1638_s15 = smov %s1302_s16 }
 0x2cd   : > { %s1637_s23 = sld [smem:[#allocation11_spill]]  ;;  %s1639_s16 = smov %s1306_s17 }
 0x2ce   : > { %s1640_s17 = smov %s1453_s11  ;;  %s1641_s18 = smov %s1314_s19 }
 0x2cf   : > { %s1643_s20 = smov %s1326_s22  ;;  %17 = sbr.rel (!%p15_p6) target bundleno = 7 (0x7), region = 126 }
 0x2d0   : > { %s1642_s19 = smov %s1634_s10 }
 0x2d2   : > { %s1644_s22 = smov %s1636_s5 }
 0x2d4   :  { %935 = vsyncpa [#allocation4], 1 }
 0x2d5   :  { %937 = vsyncpa [#allocation4 + $0x1], 1 }
 0x2d6   :  { %938 = vsyncpa [#allocation5], 1 }
 0x2d7   :  { %940 = vsyncpa [#allocation5 + $0x1], 1 }

// kernel: tpu_custom_call.1
= control target key start
LH: loop header
LB: loop body
LE: loop exit
PB: predicated region body
PF: predicated region fallthrough
CT: control target
= control target key end

     0   :  { %9 = vsyncpa [#allocation4], 0  ;;  %s1614_s0 = inlined_call_operand.vmem [shape: f32[2,16,64], index: 0, kind: input, shape index: {}]   ;;  %s1615_s1 = inlined_call_operand.vmem [shape: f32[3,32,16], index: 1, kind: input, shape index: {}]   ;;  %s1616_s2 = inlined_call_operand.hbm [shape: f32[3,64,256], index: 2, kind: input, shape index: {}]   ;;  %s1617_s3 = inlined_call_operand.vmem [shape: f32[1,256], index: 3, kind: input, shape index: {}]   ;;  %s1618_s4 = inlined_call_operand.hbm [shape: f32[2,32,256], index: 4, kind: output, shape index: {}]  }
   0x1   :  { %10 = vsyncpa [#allocation5], 0 }
   0x2   :  { %12 = vsyncpa [#allocation5 + $0x1], 0  ;;  %s1368_s15 = smov 0   ;;  %s1370_s16 = smov 0  }
   0x3   :  { %s1372_s17 = smov 0   ;;  %s1374_s18 = smov 0  }
   0x4   :  { %s1376_s19 = smov 0   ;;  %s1378_s20 = smov 0  }
   0x5   :  { %s1380_s21 = smov 0   ;;  %s1382_s22 = smov 0  }
   0x6   :  { %s1384_s23 = smov 0   ;;  %s1386_s24 = smov 0  }
   0x7 LB: > { %1623 = sst [smem:[#allocation9_spill]] %s1330_s23  ;;  %s1020_s25 = sadd.s32 4294967295, %s1334_s24   ;;  %s1334_s24 = sphi %s1386_s24, %s18_s24   ;;  %s1330_s23 = sphi %s1384_s23, %s1637_s23   ;;  %s1326_s22 = sphi %s1382_s22, %s1644_s22   ;;  %s1322_s21 = sphi %s1380_s21, %s1635_s21   ;;  %s1318_s20 = sphi %s1378_s20, %s1643_s20   ;;  %s1314_s19 = sphi %s1376_s19, %s1642_s19   ;;  %s1310_s18 = sphi %s1374_s18, %s1641_s18   ;;  %s1306_s17 = sphi %s1372_s17, %s1640_s17   ;;  %s1302_s16 = sphi %s1370_s16, %s1639_s16   ;;  %s1298_s15 = sphi %s1368_s15, %s1638_s15  }
   0x8   : > { %s1021_s26 = sadd.s32 4294967294, %s1334_s24   ;;  %s27_s27 = sadd.s32 1, %s1326_s22 }
   0x9   : > { %s30_s28 = sadd.s32 1, %s1330_s23  ;;  %p28_p0 = scmp.ge.s32.totalorder %s27_s27, 2 }
   0xa   : > { %s63_s29 = sadd.s32 1, %s1314_s19  ;;  %p70_p1 = scmp.ne.s32.totalorder %s1314_s19, %s1310_s18 }
   0xb   : > { %p71_p2 = scmp.eq.s32.totalorder %s1334_s24, 0  ;;  %s1646_s27 = smov (%p28_p0, %s27_s27), 0 }
   0xc   : > { %1624 = sst [smem:[#allocation10_spill]] %s1646_s27  ;;  %s1648_s28 = smov (!%p28_p0, %s30_s28), %s1330_s23 }
   0xd   : > { %s60_s30 = ssub.s32 %s1326_s22, %s1646_s27  ;;  %p1431_p3 = por %p71_p2, %p70_p1 }
   0xe   : > { %p32_p4 = scmp.ge.s32.totalorder %s1648_s28, 2  ;;  %p61_p5 = scmp.eq.s32.totalorder %s60_s30, 0 }
   0xf   : > { %s133_s6 = sadd.s32 1, %s1306_s17  ;;  %p143_p6 = scmp.ne.s32.totalorder %s1306_s17, %s1302_s16 }
  0x10   : > { %s1650_s28 = smov (%p32_p4, %s1648_s28), 0  ;;  %p144_p7 = scmp.eq.s32.totalorder %s1020_s25, 3 }
  0x11   : > { %1626 = sst [smem:[#allocation11_spill]] %s1650_s28  ;;  %s128_s8 = ssub.s32 %s1330_s23, %s1650_s28 }
  0x12   : > { %s1441_s7 = scalar_select %p61_p5, %s1314_s19, %s63_s29  }
  0x13   : > { %s130_s9 = sor.u32 %s128_s8, %s60_s30  ;;  %p149_p8 = scmp.ne.s32.totalorder %s1302_s16, %s1298_s15 }
  0x14   : > { %1627 = sst [smem:[#allocation12_spill]] %s1441_s7  ;;  %p131_p9 = scmp.eq.s32.totalorder %s130_s9, 0 }
  0x15   : > { %p1447_p10 = por %p144_p7, %p143_p6  ;;  %p150_p11 = scmp.eq.s32.totalorder %s1021_s26, 3 }
  0x16   : > { %p1022_p12 = scmp.ge.s32.totalorder %s1334_s24, 1  ;;  %p157_p0 = scmp.lt.s32.totalorder %s1334_s24, 5 }
  0x17   : > { %s1628_s10 = scalar_select %p1447_p10, 1, 0 }
  0x18   : > { %s1453_s11 = scalar_select %p131_p9, %s1306_s17, %s133_s6  }
  0x19   : > { %p1455_p13 = por %p150_p11, %p149_p8  ;;  %p1460_p1 = scmp.eq.s32.totalorder %s1020_s25, 0 }
  0x1a   : > { %p1464_p2 = pnand %p1022_p12, %p157_p0  ;;  %s1336_s29 = smov [#allocation3]  }
  0x1b   : > { %s1629_s12 = scalar_select %p1455_p13, 1, 0 }
  0x1c   : > { %s169_s26 = sshll.u32 %s1336_s29, 4  ;;  %p1099_p4 = pneg %p1464_p2  ;;  %s170_s26 = int_to_ptr.vmem [resolvable:$true] %s169_s26 }
  0x1d   : > { %s1207_s30 = scalar_lea.vmem %s170_s26, 6144  ;;  %p1215_p11 = scmp.lt.s32.totalorder %s170_s26, %s170_s26 }
  0x1e   : > { %p1100_p5 = pnand %p1460_p1, %p1099_p4  ;;  %p1208_p7 = scmp.ne.s32.totalorder %s170_s26, %s1207_s30 }
  0x1f   : > { %p1216_p13 = scmp.lt.s32.totalorder %s1207_s30, %s1207_s30 }
  0x20   : > { %p1198_p6 = pneg %p1100_p5 }
  0x21   : > { %p1217_p10 = por %p1216_p13, %p1215_p11 }
  0x22   : > { %p1210_p8 = pnand %p1208_p7, %p1198_p6 }
  0x24   : > { %p1211_p9 = pneg %p1210_p8 }
  0x26   : > { %p1218_p12 = pnand %p1217_p10, %p1211_p9 }
  0x28   : > { %1221 = shalt.err (!%p1218_p12)
}
  0x29   : > { %s1337_s25 = smov 256   ;;  %s1338_s6 = smov 16  }
  0x2a   : > { %1102 = dma.hbm_to_vmem [thread:$0]  (!%p1100_p5), %s1616_s2, 6144, %s170_s26, [#allocation4], %s1337_s25, %s1337_s25, %s1338_s6  }
  0x2b   : > { %p1024_p0 = scmp.ge.s32.totalorder %s1334_s24, 4 }
  0x2d   : > { %182 = sbr.rel (%p1024_p0) target bundleno = 57 (0x39), region = 24 }
  0x32   : > { %193 = sbr.rel (!%p1431_p3) target bundleno = 57 (0x39), region = 32  ;;  %s195_s29 = sand.u32 (%p1431_p3), 1, %s1314_s19  }
  0x33   : > { %s1055_s28 = sshll.u32 (%p1431_p3), %s1326_s22, 4  ;;  %s1091_s30 = smul.u32 (%p1431_p3), 48, %s195_s29 }
  0x34   : > { %s200_s7 = scalar_lea.vmem (%p1431_p3), %s1615_s1, %s1055_s28 }
  0x35   : > { %v239_v0 = vld [vmem:[%s200_s7] sm:$0xff] (%p1431_p3)  ;;  %v241_v1 = vld [vmem:[%s200_s7 + $0x8] sm:$0xff] (%p1431_p3)  ;;  %s197_s26 = scalar_lea.vmem (%p1431_p3), [#allocation2], %s1091_s30 }
  0x36   : > { %v243_v2 = vld [vmem:[%s200_s7 + $0x20] sm:$0xff] (%p1431_p3)  ;;  %v245_v3 = vld [vmem:[%s200_s7 + $0x28] sm:$0xff] (%p1431_p3)  ;;  %240 = vst [vmem:[%s197_s26] sm:$0xff] (%p1431_p3), %v239_v0  ;;  %242 = vst [vmem:[%s197_s26 + $0x8] sm:$0xff] (%p1431_p3), %v241_v1 }
  0x37   : > { %v247_v4 = vld [vmem:[%s200_s7 + $0x40] sm:$0xff]  ;;  %v249_v5 = vld [vmem:[%s200_s7 + $0x48] sm:$0xff]  ;;  %244 = vst [vmem:[%s197_s26 + $0x10] sm:$0xff] %v243_v2  ;;  %246 = vst [vmem:[%s197_s26 + $0x18] sm:$0xff] %v245_v3 }
  0x38   : > { %248 = vst [vmem:[%s197_s26 + $0x20] sm:$0xff] %v247_v4  ;;  %250 = vst [vmem:[%s197_s26 + $0x28] sm:$0xff] %v249_v5 }
  0x39 PF: > { %259 = sbr.rel (%p1464_p2) target bundleno = 706 (0x2c2), region = 70  ;;  %s262_s23 = sand.u32 (!%p1464_p2), 1, %s1310_s18  }
  0x3a   : > { %s1092_s27 = smul.u32 (!%p1464_p2), 48, %s262_s23 }
  0x3c   : > { %s1486_s28 = scalar_lea.vmem (!%p1464_p2), [#allocation2], %s1092_s27 }
  0x3e   : > { %1289 = dma.done.wait (%p1460_p1), [#allocation4], 6144  }
  0x3f   : > { %1291 = vsyncadd (%p1460_p1), [#allocation4], 4294961152  ;;  %p296_p3 = scmp.lt.s32.totalorder %s1322_s21, 1  ;;  %vm319_vm0 = vcmask 130048   ;;  %v317_v8 = vld [vmem:[%s1486_s28] sm:$0xff]  ;;  %v318_v9 = vld [vmem:[%s1486_s28 + $0x8] sm:$0xff] }
  0x40   : > { %1074 = vmatprep.mubr.msk.f32.mxu1 %vm319_vm0, %v317_v8  ;;  %v416_v10 = vld [vmem:[#allocation3 + $0x78] sm:$0xff]  ;;  %v415_v11 = vld [vmem:[#allocation3 + $0x70] sm:$0xff]  ;;  %v414_v12 = vld [vmem:[#allocation3 + $0x68] sm:$0xff]  ;;  %v1339_v26 = vmov 0.0   ;;  %vm417_vm1 = vcmask 523264   ;;  %s293_s8 = sand.u32 1, %s1302_s16  }
  0x41   : > { %s297_s5 = scalar_select %p296_p3, %s1322_s21, 1  ;;  %v413_v13 = vld [vmem:[#allocation3 + $0x60] sm:$0xff]  ;;  %v412_v14 = vld [vmem:[#allocation3 + $0x58] sm:$0xff]  ;;  %v411_v15 = vld [vmem:[#allocation3 + $0x50] sm:$0xff]  ;;  %676 = vmatprep.mubr.f32.mxu0 %v1339_v26 }
  0x42   : > { %v410_v16 = vld [vmem:[#allocation3 + $0x48] sm:$0xff]  ;;  %v409_v17 = vld [vmem:[#allocation3 + $0x40] sm:$0xff]  ;;  %v408_v18 = vld [vmem:[#allocation3 + $0x38] sm:$0xff]  ;;  %s1029_s9 = sshll.u32 %s293_s8, 5  ;;  %s1057_s29 = sshll.u32 %s1318_s20, 2 }
  0x43   : > { %s1056_s7 = sshll.u32 %s297_s5, 4  ;;  %v407_v19 = vld [vmem:[#allocation3 + $0x30] sm:$0xff]  ;;  %v406_v20 = vld [vmem:[#allocation3 + $0x28] sm:$0xff]  ;;  %v405_v21 = vld [vmem:[#allocation3 + $0x20] sm:$0xff]  ;;  %s1051_s30 = sshll.u32 %s1322_s21, 3 }
  0x44   : > { %s300_s6 = scalar_lea.vmem %s1614_s0, %s1056_s7  ;;  %v404_v22 = vld [vmem:[#allocation3 + $0x18] sm:$0xff]  ;;  %v403_v23 = vld [vmem:[#allocation3 + $0x10] sm:$0xff]  ;;  %v402_v24 = vld [vmem:[#allocation3 + $0x8] sm:$0xff]  ;;  %s911_s26 = sadd.s32 %s1057_s29, %s1051_s30 }
  0x45   : > { %v1497_v6 = vld [vmem:[%s300_s6 + $0x8] sm:$0xff]  ;;  %v1499_v7 = vld [vmem:[%s300_s6] sm:$0xff]  ;;  %v605_v27 = vld [vmem:[#allocation3 + $0xf8] sm:$0xff]  ;;  %s295_s23 = scalar_lea.vmem [#allocation6], %s1029_s9  ;;  %s1052_s21 = sshll.u32 %s911_s26, 7 }
  0x46   : > { %1070 = vmatprep.subr.mxu1 %v1497_v6  ;;  %v401_v25 = vld [vmem:[#allocation3] sm:$0xff]  ;;  %v604_v28 = vld [vmem:[#allocation3 + $0xf0] sm:$0xff]  ;;  %v603_v29 = vld [vmem:[#allocation3 + $0xe8] sm:$0xff]  ;;  %628 = vmatprep.subr.mxu0 %v605_v27  ;;  %s914_s20 = sshll.u32 %s295_s23, 4  ;;  %s1553_s5 = scalar_lea.hbm %s1618_s4, %s1052_s21  ;;  %s1548_s20 = int_to_ptr.vmem [resolvable:$true] %s914_s20 }
  0x47   : > { %1071 = vmatpush3.msra.mxu1 %v1497_v6  ;;  %v602_v30 = vld [vmem:[#allocation3 + $0xe0] sm:$0xff]  ;;  %629 = vmatpush1.msra.mxu0 %v604_v28  ;;  %v601_v31 = vld [vmem:[#allocation3 + $0xd8] sm:$0xff]  ;;  %v600_v32 = vld [vmem:[#allocation3 + $0xd0] sm:$0xff]  ;;  %s1557_s7 = scalar_lea.sflag [#allocation5], %s293_s8  ;;  %s1222_s14 = scalar_lea.vmem %s1548_s20, 512 }
  0x48   : > { %1072 = vmatprep.subr.mxu1 %v1499_v7  ;;  %630 = vmatprep.subr.mxu0 %v603_v29  ;;  %v1036_v35 = vld [vmem:[%s1486_s28 + $0x10] sm:$0xff]  ;;  %v1037_v36 = vld [vmem:[%s1486_s28 + $0x18] sm:$0xff]  ;;  %v1042_v37 = vld [vmem:[%s1486_s28 + $0x20] sm:$0xff]  ;;  %p1223_p10 = scmp.ne.s32.totalorder %s1548_s20, %s1222_s14  ;;  %p1632_p13 = scmp.ne.s32.totalorder %s1628_s10, 0 }
  0x49   : > { %1073 = vmatpush3.msra.mxu1 %v1499_v7  ;;  %631 = vmatpush1.msra.mxu0 %v602_v30  ;;  %v1043_v38 = vld [vmem:[%s1486_s28 + $0x28] sm:$0xff]  ;;  %v598_v40 = vld [vmem:[#allocation3 + $0xc0] sm:$0xff]  ;;  %v596_v42 = vld [vmem:[#allocation3 + $0xb0] sm:$0xff]  ;;  %s1340_s25 = smov [#allocation6]  }
  0x4a   : > { %1075 = vmatmul.mubr.msk.f32.vlgmr.msra.gmra.mxu1 %vm319_vm0, %v318_v9  ;;  %440 = vmatprep.subr.mxu1 %v416_v10  ;;  %v599_v39 = vld [vmem:[#allocation3 + $0xc8] sm:$0xff]  ;;  %v597_v41 = vld [vmem:[#allocation3 + $0xb8] sm:$0xff]  ;;  %v594_v44 = vld [vmem:[#allocation3 + $0xa0] sm:$0xff]  ;;  %v307_v9 = vlaneseq  ;;  %p1224_p1 = pnand %p1223_p10, %p1632_p13  ;;  %s1226_s6 = sshll.u32 %s1340_s25, 4  ;;  %s1227_s6 = int_to_ptr.vmem [resolvable:$false] %s1226_s6 }
  0x4b   : > { %441 = vmatpush1.msra.mxu1 %v415_v11  ;;  %488 = vmatprep.mubr.f32.mxu1 %v1339_v26  ;;  %v595_v43 = vld [vmem:[#allocation3 + $0xa8] sm:$0xff]  ;;  %v593_v45 = vld [vmem:[#allocation3 + $0x98] sm:$0xff]  ;;  %v592_v46 = vld [vmem:[#allocation3 + $0x90] sm:$0xff]  ;;  %s1228_s18 = scalar_lea.vmem %s1227_s6, 1024  ;;  %p1229_p4 = scmp.lt.s32.totalorder %s1548_s20, %s1227_s6 }
  0x4c   : > { %442 = vmatprep.subr.mxu1 %v414_v12  ;;  %632 = vmatprep.subr.mxu0 %v601_v31  ;;  %v591_v47 = vld [vmem:[#allocation3 + $0x88] sm:$0xff]  ;;  %v590_v48 = vld [vmem:[#allocation3 + $0x80] sm:$0xff]  ;;  %v793_v49 = vld [vmem:[#allocation3 + $0x178] sm:$0xff]  ;;  %v308_v10 = vshrl.u32 %v307_v9, 7  ;;  %p1225_p2 = pneg %p1224_p1  ;;  %p1230_p5 = scmp.lt.s32.totalorder %s1228_s18, %s1222_s14 }
  0x4d   : > { %443 = vmatpush1.msra.mxu1 %v413_v13  ;;  %633 = vmatpush1.msra.mxu0 %v600_v32  ;;  %v792_v55 = vld [vmem:[#allocation3 + $0x170] sm:$0xff]  ;;  %v791_v57 = vld [vmem:[#allocation3 + $0x168] sm:$0xff]  ;;  %v790_v58 = vld [vmem:[#allocation3 + $0x160] sm:$0xff] }
  0x4e   : > { %444 = vmatprep.subr.mxu1 %v412_v14  ;;  %634 = vmatprep.subr.mxu0 %v599_v39  ;;  %v789_v59 = vld [vmem:[#allocation3 + $0x158] sm:$0xff]  ;;  %v788_v60 = vld [vmem:[#allocation3 + $0x150] sm:$0xff]  ;;  %v787_v61 = vld [vmem:[#allocation3 + $0x148] sm:$0xff]  ;;  %v309_v12 = vsub.s32 0, %v308_v10  ;;  %p1231_p6 = por %p1230_p5, %p1229_p4 }
  0x4f   : > { %445 = vmatpush1.msra.mxu1 %v411_v15  ;;  %635 = vmatpush1.msra.mxu0 %v598_v40  ;;  %v786_v62 = vld [vmem:[#allocation3 + $0x140] sm:$0xff]  ;;  %v785_v63 = vld [vmem:[#allocation3 + $0x138] sm:$0xff]  ;;  %v784_v0 = vld [vmem:[#allocation3 + $0x130] sm:$0xff]  ;;  %v313_v15 = vsub.s32 1, %v308_v10 }
  0x50   : > { %446 = vmatprep.subr.mxu1 %v410_v16  ;;  %636 = vmatprep.subr.mxu0 %v597_v41  ;;  %v783_v1 = vld [vmem:[#allocation3 + $0x128] sm:$0xff]  ;;  %v782_v2 = vld [vmem:[#allocation3 + $0x120] sm:$0xff]  ;;  %v781_v3 = vld [vmem:[#allocation3 + $0x118] sm:$0xff]  ;;  %p1232_p7 = pnand %p1231_p6, %p1225_p2 }
  0x51   : > { %447 = vmatpush1.msra.mxu1 %v409_v17  ;;  %637 = vmatpush1.msra.mxu0 %v596_v42  ;;  %v780_v4 = vld [vmem:[#allocation3 + $0x110] sm:$0xff]  ;;  %v305_v13 = vld [vmem:[%s1617_s3] sm:$0x3] }
  0x52   : > { %448 = vmatprep.subr.mxu1 %v408_v18  ;;  %638 = vmatprep.subr.mxu0 %v595_v43  ;;  %v310_v16 = vrot.slane %v305_v13, %v309_v12  ;;  %v314_v18 = vrot.slane %v305_v13, %v313_v15 }
  0x53   : > { %449 = vmatpush1.msra.mxu1 %v407_v19  ;;  %639 = vmatpush1.msra.mxu0 %v594_v44 }
  0x54   : > { %450 = vmatprep.subr.mxu1 %v406_v20  ;;  %640 = vmatprep.subr.mxu0 %v593_v45 }
  0x55   : > { %451 = vmatpush1.msra.mxu1 %v405_v21  ;;  %641 = vmatpush1.msra.mxu0 %v592_v46 }
  0x56   : > { %452 = vmatprep.subr.mxu1 %v404_v22  ;;  %642 = vmatprep.subr.mxu0 %v591_v47 }
  0x57   : > { %453 = vmatpush1.msra.mxu1 %v403_v23  ;;  %643 = vmatpush1.msra.mxu0 %v590_v48 }
  0x58   : > { %454 = vmatprep.subr.mxu1 %v402_v24  ;;  %816 = vmatprep.subr.mxu0 %v793_v49 }
  0x59   : > { %455 = vmatpush1.msra.mxu1 %v401_v25 }
  0x5a   : > { %1077 = vmatprep.subr.mxu1 %v1497_v6 }
 0x10a   : > { %v1076_v33 = vpop.f32.mrf.mxu1 }
 0x10c   : > { %v392_v34 = vpop.f32.mrf.mxu1 }
 0x10d   : > { %1034 = vmatmul.mubr.msk.f32.vlgmr.msra.gmra.mxu1 %vm417_vm1, %v392_v34 }
 0x10e   : > { %1078 = vmatpush3.msra.mxu1 %v1497_v6  ;;  %494 = vmatprep.mubr.f32.mxu1 %v1339_v26 }
 0x10f   : > { %1079 = vmatprep.subr.mxu1 %v1499_v7 }
 0x110   : > { %1080 = vmatpush3.msra.mxu1 %v1499_v7 }
 0x111   : > { %1035 = vmatmul.mubr.msk.f32.gmra.mxu1 %vm417_vm1, %v1076_v33  ;;  %1084 = vmatprep.subr.mxu1 %v1497_v6 }
 0x112   : > { %1081 = vmatprep.mubr.msk.f32.mxu1 %vm319_vm0, %v1036_v35 }
 0x115   : > { %1082 = vmatmul.mubr.msk.f32.vlgmr.msra.gmra.mxu1 %vm319_vm0, %v1037_v36 }
 0x116   : > { %1085 = vmatpush3.msra.mxu1 %v1497_v6  ;;  %1088 = vmatprep.mubr.msk.f32.mxu1 %vm319_vm0, %v1042_v37  ;;  %v779_v6 = vld [vmem:[#allocation3 + $0x108] sm:$0xff] }
 0x117   : > { %1086 = vmatprep.subr.mxu1 %v1499_v7 }
 0x118   : > { %1087 = vmatpush3.msra.mxu1 %v1499_v7  ;;  %v778_v7 = vld [vmem:[#allocation3 + $0x100] sm:$0xff] }
 0x119   : > { %1089 = vmatmul.mubr.msk.f32.vlgmr.msra.gmra.mxu1 %vm319_vm0, %v1043_v38 }
 0x1cd   : > { %v490_v50 = vpop.f32.mrf.mxu1 }
 0x1ce   : > { %v501_v19 = vadd.f32 %v490_v50, %v310_v16 }
 0x1cf   : > { %v492_v51 = vpop.f32.mrf.mxu1 }
 0x1d0   : > { %v502_v21 = vadd.f32 %v492_v51, %v314_v18 }
 0x1d1   : > { %v496_v52 = vpop.f32.mrf.mxu1 }
 0x1d2   : > { %v503_v24 = vadd.f32 %v496_v52, %v310_v16 }
 0x1d3   : > { %v1530_v53 = vpop.f32.mrf.mxu1 }
 0x1d4   : > { %v504_v27 = vadd.f32 %v1530_v53, %v314_v18 }
 0x1d5   : > { %v1083_v54 = vpop.f32.mrf.mxu1 }
 0x1d7   : > { %v580_v56 = vpop.f32.mrf.mxu1 }
 0x1d8   : > { %1040 = vmatmul.mubr.msk.f32.vlgmr.msra.gmra.mxu0 %vm417_vm1, %v580_v56 }
 0x1d9   : > { %817 = vmatpush1.msra.mxu0 %v792_v55  ;;  %682 = vmatprep.mubr.f32.mxu0 %v1339_v26  ;;  %v1090_v5 = vpop.f32.mrf.mxu1 }
 0x1da   : > { %818 = vmatprep.subr.mxu0 %v791_v57 }
 0x1db   : > { %819 = vmatpush1.msra.mxu0 %v790_v58  ;;  %v768_v8 = vpop.f32.mrf.mxu1 }
 0x1dc   : > { %820 = vmatprep.subr.mxu0 %v789_v59  ;;  %1041 = vmatmul.mubr.msk.f32.gmra.mxu0 %vm417_vm1, %v1083_v54 }
 0x1dd   : > { %821 = vmatpush1.msra.mxu0 %v788_v60  ;;  %864 = vmatprep.mubr.f32.mxu0 %v1339_v26 }
 0x1de   : > { %822 = vmatprep.subr.mxu0 %v787_v61 }
 0x1df   : > { %823 = vmatpush1.msra.mxu0 %v786_v62 }
 0x1e0   : > { %824 = vmatprep.subr.mxu0 %v785_v63 }
 0x1e1   : > { %825 = vmatpush1.msra.mxu0 %v784_v0 }
 0x1e2   : > { %826 = vmatprep.subr.mxu0 %v783_v1 }
 0x1e3   : > { %827 = vmatpush1.msra.mxu0 %v782_v2 }
 0x1e4   : > { %828 = vmatprep.subr.mxu0 %v781_v3 }
 0x1e5   : > { %829 = vmatpush1.msra.mxu0 %v780_v4 }
 0x1e6   : > { %830 = vmatprep.subr.mxu0 %v779_v6 }
 0x1e7   : > { %831 = vmatpush1.msra.mxu0 %v778_v7 }
 0x1e8   : > { %1046 = vmatmul.mubr.msk.f32.vlgmr.msra.gmra.mxu0 %vm417_vm1, %v768_v8 }
 0x1e9   : > { %870 = vmatprep.mubr.f32.mxu0 %v1339_v26 }
 0x1ec   : > { %1047 = vmatmul.mubr.msk.f32.gmra.mxu0 %vm417_vm1, %v1090_v5 }
 0x298   : > { %v678_v11 = vpop.f32.mrf.mxu0 }
 0x299   : > { %v689_v22 = vadd.f32 %v678_v11, %v501_v19 }
 0x29a   : > { %v680_v14 = vpop.f32.mrf.mxu0 }
 0x29b   : > { %v690_v25 = vadd.f32 %v680_v14, %v502_v21 }
 0x29c   : > { %v684_v17 = vpop.f32.mrf.mxu0 }
 0x29d   : > { %v691_v29 = vadd.f32 %v684_v17, %v503_v24 }
 0x29e   : > { %v686_v20 = vpop.f32.mrf.mxu0 }
 0x29f   : > { %v692_v32 = vadd.f32 %v686_v20, %v504_v27 }
 0x2a8   : > { %v866_v23 = vpop.f32.mrf.mxu0 }
 0x2a9   : > { %v877_v26 = vadd.f32 %v866_v23, %v689_v22 }
 0x2aa   : > { %v868_v28 = vpop.f32.mrf.mxu0 }
 0x2ab   : > { %vm881_vm2 = vcmp.ge.f32.partialorder %v877_v26, 0.0  ;;  %v885_v30 = vmul.f32 0.01, %v877_v26  ;;  %v878_v31 = vadd.f32 %v868_v28, %v690_v25 }
 0x2ac   : > { %v872_v33 = vpop.f32.mrf.mxu0 }
 0x2ad   : > { %v889_v34 = vsel %vm881_vm2, %v877_v26, %v885_v30  ;;  %vm882_vm3 = vcmp.ge.f32.partialorder %v878_v31, 0.0  ;;  %v886_v35 = vmul.f32 0.01, %v878_v31  ;;  %v879_v36 = vadd.f32 %v872_v33, %v691_v29 }
 0x2ae   : > { %893 = vst [vmem:[%s295_s23] sm:$0xff] %v889_v34  ;;  %v874_v37 = vpop.f32.mrf.mxu0 }
 0x2af   : > { %v890_v38 = vsel %vm882_vm3, %v878_v31, %v886_v35  ;;  %vm883_vm4 = vcmp.ge.f32.partialorder %v879_v36, 0.0  ;;  %v887_v39 = vmul.f32 0.01, %v879_v36  ;;  %v880_v40 = vadd.f32 %v874_v37, %v692_v32 }
 0x2b0   : > { %894 = vst [vmem:[%s295_s23 + $0x8] sm:$0xff] %v890_v38 }
 0x2b1   : > { %v891_v41 = vsel %vm883_vm4, %v879_v36, %v887_v39  ;;  %vm884_vm5 = vcmp.ge.f32.partialorder %v880_v40, 0.0  ;;  %v888_v42 = vmul.f32 0.01, %v880_v40 }
 0x2b2   : > { %895 = vst [vmem:[%s295_s23 + $0x10] sm:$0xff] %v891_v41 }
 0x2b3   : > { %v892_v43 = vsel %vm884_vm5, %v880_v40, %v888_v42 }
 0x2b4   : > { %896 = vst [vmem:[%s295_s23 + $0x18] sm:$0xff] %v892_v43 }
 0x2b5   : > { %1235 = shalt.err (!%p1232_p7)
}
 0x2b6   : > { %s1236_s13 = scalar_lea.hbm %s1553_s5, 512  ;;  %s1240_s29 = scalar_lea.hbm %s1618_s4, 2048 }
 0x2b7   : > { %p1237_p8 = scmp.ne.s32.totalorder %s1553_s5, %s1236_s13  ;;  %p1241_p12 = scmp.lt.s32.totalorder %s1553_s5, %s1618_s4 }
 0x2b8   : > { %p1242_p0 = scmp.lt.s32.totalorder %s1240_s29, %s1236_s13 }
 0x2b9   : > { %p1238_p9 = pnand %p1237_p8, %p1632_p13 }
 0x2ba   : > { %p1243_p3 = por %p1242_p0, %p1241_p12 }
 0x2bb   : > { %p1239_p11 = pneg %p1238_p9 }
 0x2bd   : > { %p1244_p10 = pnand %p1243_p3, %p1239_p11 }
 0x2bf   : > { %1247 = shalt.err (!%p1244_p10)
}
 0x2c0   : > { %s1341_s23 = smov 256   ;;  %s1342_s21 = smov 16  }
 0x2c1   : > { %1097 = dma.vmem_to_hbm [thread:$0]  (%p1632_p13), %s1548_s20, 512, %s1553_s5, %s1557_s7, %s1341_s23, %s1341_s23, %s1342_s21  }
 0x2c2 PF: > { %p1109_p1 = scmp.ge.s32.totalorder %s1334_s24, 2  ;;  %s929_s27 = sand.u32 1, %s1298_s15  }
 0x2c3   : > { %p1633_p2 = scmp.ne.s32.totalorder %s1629_s12, 0  ;;  %s930_s28 = scalar_lea.sflag [#allocation5], %s929_s27 }
 0x2c5   : > { %p1104_p4 = pnand %p1109_p1, %p1633_p2 }
 0x2c7   : > { %p1105_p5 = pneg %p1104_p4 }
 0x2c9   : > { %1293 = dma.done.wait (%p1105_p5), %s930_s28, 512  }
 0x2ca   : > { %1295 = vsyncadd (%p1105_p5), %s930_s28, 4294966784  ;;  %s18_s24 = sadd.s32 1, %s1334_s24   ;;  %s1634_s10 = sld [smem:[#allocation12_spill]] }
 0x2cb   : > { %p15_p6 = scmp.ge.s32.totalorder %s18_s24, 6   ;;  %s1635_s21 = sld [smem:[#allocation9_spill]] }
 0x2cc   : > { %s1636_s5 = sld [smem:[#allocation10_spill]]  ;;  %s1638_s15 = smov %s1302_s16 }
 0x2cd   : > { %s1637_s23 = sld [smem:[#allocation11_spill]]  ;;  %s1639_s16 = smov %s1306_s17 }
 0x2ce   : > { %s1640_s17 = smov %s1453_s11  ;;  %s1641_s18 = smov %s1314_s19 }
 0x2cf   : > { %s1643_s20 = smov %s1326_s22  ;;  %17 = sbr.rel (!%p15_p6) target bundleno = 7 (0x7), region = 126 }
 0x2d0   : > { %s1642_s19 = smov %s1634_s10 }
 0x2d2   : > { %s1644_s22 = smov %s1636_s5 }
 0x2d4   :  { %935 = vsyncpa [#allocation4], 1 }
 0x2d5   :  { %937 = vsyncpa [#allocation4 + $0x1], 1 }
 0x2d6   :  { %938 = vsyncpa [#allocation5], 1 }
 0x2d7   :  { %940 = vsyncpa [#allocation5 + $0x1], 1 }

</bundles_post_ra>
